<compile_context>
chip_gen: v6e
topology: v6e:2x2x1
jax: 0.10.0
libtpu: 0.0.40
codegen_flags: <defaults>
</compile_context>

<pallas_src>
import functools

import jax
import jax.numpy as jnp
from jax.experimental import pallas as pl
from jax.experimental.pallas import tpu as pltpu


def _round_up(x, m):
    return (x + m - 1) // m * m


def _pick_tile(b_pad):
    for t in (512, 256, 128, 64, 32, 16, 8):
        if b_pad % t == 0:
            return t
    return b_pad  # unreachable (b_pad is a multiple of 8)


def _a2c_fused_kernel(
    x_ref,    # (TILE_B, D)        bf16 flattened states
    w1_ref,   # (D, 256)           bf16 backbone weight
    b1_ref,   # (1, 256)           f32
    w2_ref,   # (256, 192)         bf16 fused [logits_l1 | V_l1]
    b2_ref,   # (1, 192)           f32
    w3_ref,   # (192, OUT_N)       bf16 block-diag [logits_l2 ; V_l2], zero-padded
    b3_ref,   # (1, OUT_N)         f32
    out_ref,  # (TILE_B, OUT_N)    f32 lane-dense output slab
):
    # Backbone: Linear(D, 256) + ReLU.  MXU in bf16, accumulate f32.
    h = jnp.dot(x_ref[...], w1_ref[...],
                preferred_element_type=jnp.float32) + b1_ref[...]
    h = jnp.maximum(h, 0.0)

    # Fused first layers of both heads: one (256 -> 192) matmul.
    h2 = jnp.dot(h.astype(jnp.bfloat16), w2_ref[...],
                 preferred_element_type=jnp.float32) + b2_ref[...]
    h2 = jnp.maximum(h2, 0.0)

    # Fused second layers (block-diagonal): lanes [0:A] = logits, lane A = V.
    out_ref[...] = jnp.dot(h2.astype(jnp.bfloat16), w3_ref[...],
                           preferred_element_type=jnp.float32) + b3_ref[...]


@functools.partial(jax.jit, static_argnames=("n_actions",))
def a2c_forward(state_t, fused_params, *, n_actions):
    """state_t: (B, num_features, features_len).

    Returns (logits: (B, n_actions), V: (B,)) — matching the PyTorch forward
    (V_net output squeezed).
    """
    w1, b1, w2f, b2f, w3f, b3f = fused_params
    B = state_t.shape[0]
    D = w1.shape[0]
    OUT_N = w3f.shape[1]

    x = state_t.astype(jnp.float32).reshape(B, -1)  # nn.Flatten(), row-major

    # Pad batch to a sublane-aligned tile multiple; pick the largest tile that
    # divides the padded batch (up to 512 rows per grid step).
    B_pad = _round_up(B, 8)
    TILE_B = _pick_tile(B_pad)
    if B_pad != B:
        x = jnp.pad(x, ((0, B_pad - B), (0, 0)))
    x = x.astype(jnp.bfloat16)

    grid = (B_pad // TILE_B,)

    out = pl.pallas_call(
        _a2c_fused_kernel,
        out_shape=jax.ShapeDtypeStruct((B_pad, OUT_N), jnp.float32),
        grid_spec=pltpu.PrefetchScalarGridSpec(
            num_scalar_prefetch=0,
            grid=grid,
            in_specs=[
                pl.BlockSpec((TILE_B, D), lambda i: (i, 0)),
                pl.BlockSpec(w1.shape, lambda i: (0, 0)),
                pl.BlockSpec(b1.shape, lambda i: (0, 0)),
                pl.BlockSpec(w2f.shape, lambda i: (0, 0)),
                pl.BlockSpec(b2f.shape, lambda i: (0, 0)),
                pl.BlockSpec(w3f.shape, lambda i: (0, 0)),
                pl.BlockSpec(b3f.shape, lambda i: (0, 0)),
            ],
            out_specs=pl.BlockSpec((TILE_B, OUT_N), lambda i: (i, 0)),
        ),
        compiler_params=pltpu.CompilerParams(
            dimension_semantics=("parallel",)),
    )(x, w1, b1, w2f, b2f, w3f, b3f)

    out = out[:B]
    logits = out[:, :n_actions]
    v = out[:, n_actions]  # .squeeze() on (B, 1) -> (B,)
    return logits, v


def fuse_params(params, n_actions):
    """Pack raw per-layer params into the fused/packed kernel layout.

    - w2|wv1 concatenated along out-dim -> (256, 192), biases likewise.
    - w3 / wv2 packed block-diagonally into a zero-padded (192, OUT_N) weight
      so lanes [0:A] carry logits and lane A carries the value.
    Weights are cast to bf16 (MXU operands); biases stay f32 (added to the
    f32 accumulator).
    """
    (w1, b1, w2, b2, w3, b3, wv1, bv1, wv2, bv2) = params
    h2 = w2.shape[1]   # 128
    hv = wv1.shape[1]  # 64
    out_n = max(128, _round_up(n_actions + 1, 128))

    w2f = jnp.concatenate([w2, wv1], axis=1)          # (256, 192)
    b2f = jnp.concatenate([b2, bv1], axis=1)          # (1, 192)

    w3f = jnp.zeros((h2 + hv, out_n), jnp.float32)
    w3f = w3f.at[:h2, :n_actions].set(w3)             # logits block
    w3f = w3f.at[h2:, n_actions].set(wv2[:, 0])       # value column

    b3f = jnp.zeros((1, out_n), jnp.float32)
    b3f = b3f.at[:, :n_actions].set(b3)
    b3f = b3f.at[:, n_actions].set(bv2[:, 0])

    return (
        w1.astype(jnp.bfloat16), b1,
        w2f.astype(jnp.bfloat16), b2f,
        w3f.astype(jnp.bfloat16), b3f,
    )


def init_params(key, n_actions, num_features, features_len):
    """Deterministic synthetic init mirroring the PyTorch Linear shapes.
    Weight layout is (in, out) = torch weight.T; biases zero."""
    # TODO(synk): torch orthogonal_ init has no built-in here; using a scaled
    # normal stand-in with the same gain — forward math is identical.
    d = num_features * features_len
    ks = jax.random.split(key, 5)

    def w(k, fan_in, fan_out):
        return (jax.random.normal(k, (fan_in, fan_out), jnp.float32)
                * jnp.sqrt(2.0 / fan_in))

    w1 = w(ks[0], d, 256)
    b1 = jnp.zeros((1, 256), jnp.float32)
    w2 = w(ks[1], 256, 128)
    b2 = jnp.zeros((1, 128), jnp.float32)
    w3 = w(ks[2], 128, n_actions)
    b3 = jnp.zeros((1, n_actions), jnp.float32)
    wv1 = w(ks[3], 256, 64)
    bv1 = jnp.zeros((1, 64), jnp.float32)
    wv2 = w(ks[4], 64, 1)
    bv2 = jnp.zeros((1, 1), jnp.float32)
    return (w1, b1, w2, b2, w3, b3, wv1, bv1, wv2, bv2)


if __name__ == "__main__":
    # Small shapes consistent with the module's forward:
    # state_t: (batch_size, num_features, features_len)
    batch_size, num_features, features_len, n_actions = 2, 4, 8, 6

    key = jax.random.PRNGKey(0)
    k_params, k_x = jax.random.split(key)

    params = init_params(k_params, n_actions, num_features, features_len)
    fused = fuse_params(params, n_actions)
    state_t = jax.random.normal(
        k_x, (batch_size, num_features, features_len), jnp.float32
    )

    logits, v = a2c_forward(state_t, fused, n_actions=n_actions)
    jax.block_until_ready((logits, v))

    assert logits.shape == (batch_size, n_actions), logits.shape
    assert v.shape == (batch_size,), v.shape

    # Reference with the same bf16-operand / f32-accumulate math (plain JAX).
    (w1, b1, w2, b2, w3, b3, wv1, bv1, wv2, bv2) = params
    bf = jnp.bfloat16
    x = state_t.reshape(batch_size, -1)
    h = jnp.maximum(
        jnp.dot(x.astype(bf), w1.astype(bf),
                preferred_element_type=jnp.float32) + b1, 0.0)
    hl = jnp.maximum(
        jnp.dot(h.astype(bf), w2.astype(bf),
                preferred_element_type=jnp.float32) + b2, 0.0)
    ref_logits = jnp.dot(hl.astype(bf), w3.astype(bf),
                         preferred_element_type=jnp.float32) + b3
    hv = jnp.maximum(
        jnp.dot(h.astype(bf), wv1.astype(bf),
                preferred_element_type=jnp.float32) + bv1, 0.0)
    ref_v = jnp.squeeze(
        jnp.dot(hv.astype(bf), wv2.astype(bf),
                preferred_element_type=jnp.float32) + bv2, axis=-1)

    assert jnp.allclose(logits, ref_logits, atol=1e-2, rtol=1e-2), (
        jnp.max(jnp.abs(logits - ref_logits)))
    assert jnp.allclose(v, ref_v, atol=1e-2, rtol=1e-2), (
        jnp.max(jnp.abs(v - ref_v)))

    print("KERNEL_OK")
</pallas_src>

<mosaic_0001>
module attributes {stable_mosaic.version = 11 : i64} {
  func.func @_a2c_fused_kernel(%arg0: i32, %arg1: memref<8x32xbf16, #tpu.memory_space<vmem>>, %arg2: memref<32x256xbf16, #tpu.memory_space<vmem>>, %arg3: memref<1x256xf32, #tpu.memory_space<vmem>>, %arg4: memref<256x192xbf16, #tpu.memory_space<vmem>>, %arg5: memref<1x192xf32, #tpu.memory_space<vmem>>, %arg6: memref<192x128xbf16, #tpu.memory_space<vmem>>, %arg7: memref<1x128xf32, #tpu.memory_space<vmem>>, %arg8: memref<8x128xf32, #tpu.memory_space<vmem>>) attributes {dimension_semantics = [#tpu.dimension_semantics<parallel>], iteration_bounds = array<i64: 1>, scalar_prefetch = 0 : i64, scratch_operands = 0 : i64, tpu.core_type = #tpu.core_type<tc>, window_params = [{transform_indices = @transform_0, window_bounds = array<i64: 8, 32>}, {pipeline_mode = #tpu.pipeline_mode<synchronous>, transform_indices = @transform_1, window_bounds = array<i64: 32, 256>}, {pipeline_mode = #tpu.pipeline_mode<synchronous>, transform_indices = @transform_2, window_bounds = array<i64: 1, 256>}, {pipeline_mode = #tpu.pipeline_mode<synchronous>, transform_indices = @transform_3, window_bounds = array<i64: 256, 192>}, {pipeline_mode = #tpu.pipeline_mode<synchronous>, transform_indices = @transform_4, window_bounds = array<i64: 1, 192>}, {pipeline_mode = #tpu.pipeline_mode<synchronous>, transform_indices = @transform_5, window_bounds = array<i64: 192, 128>}, {pipeline_mode = #tpu.pipeline_mode<synchronous>, transform_indices = @transform_6, window_bounds = array<i64: 1, 128>}, {transform_indices = @transform_7, window_bounds = array<i64: 8, 128>}]} {
    %c0 = arith.constant 0 : index
    %c0_0 = arith.constant 0 : index
    %0 = vector.load %arg1[%c0, %c0_0] : memref<8x32xbf16, #tpu.memory_space<vmem>>, vector<8x32xbf16>
    %c0_1 = arith.constant 0 : index
    %c0_2 = arith.constant 0 : index
    %1 = vector.load %arg2[%c0_1, %c0_2] : memref<32x256xbf16, #tpu.memory_space<vmem>>, vector<32x256xbf16>
    %cst = arith.constant dense<0.000000e+00> : vector<8x256xf32>
    %2 = tpu.matmul %0, %1, %cst {dimension_numbers = #tpu.dot_dimension_numbers<[1], [0], [0], [1], [0, 0, 1, 1], [], []>} : vector<8x32xbf16>, vector<32x256xbf16>, vector<8x256xf32> -> vector<8x256xf32>
    %c0_3 = arith.constant 0 : index
    %c0_4 = arith.constant 0 : index
    %3 = vector.load %arg3[%c0_3, %c0_4] : memref<1x256xf32, #tpu.memory_space<vmem>>, vector<1x256xf32>
    %4 = vector.broadcast %3 : vector<1x256xf32> to vector<8x256xf32>
    %5 = arith.addf %2, %4 : vector<8x256xf32>
    %cst_5 = arith.constant 0.000000e+00 : f32
    %6 = vector.broadcast %cst_5 : f32 to vector<8x256xf32>
    %7 = arith.maximumf %5, %6 : vector<8x256xf32>
    %8 = arith.truncf %7 : vector<8x256xf32> to vector<8x256xbf16>
    %c0_6 = arith.constant 0 : index
    %c0_7 = arith.constant 0 : index
    %9 = vector.load %arg4[%c0_6, %c0_7] : memref<256x192xbf16, #tpu.memory_space<vmem>>, vector<256x192xbf16>
    %cst_8 = arith.constant dense<0.000000e+00> : vector<8x192xf32>
    %10 = tpu.matmul %8, %9, %cst_8 {dimension_numbers = #tpu.dot_dimension_numbers<[1], [0], [0], [1], [0, 0, 1, 1], [], []>} : vector<8x256xbf16>, vector<256x192xbf16>, vector<8x192xf32> -> vector<8x192xf32>
    %c0_9 = arith.constant 0 : index
    %c0_10 = arith.constant 0 : index
    %11 = vector.load %arg5[%c0_9, %c0_10] : memref<1x192xf32, #tpu.memory_space<vmem>>, vector<1x192xf32>
    %12 = vector.broadcast %11 : vector<1x192xf32> to vector<8x192xf32>
    %13 = arith.addf %10, %12 : vector<8x192xf32>
    %cst_11 = arith.constant 0.000000e+00 : f32
    %14 = vector.broadcast %cst_11 : f32 to vector<8x192xf32>
    %15 = arith.maximumf %13, %14 : vector<8x192xf32>
    %16 = arith.truncf %15 : vector<8x192xf32> to vector<8x192xbf16>
    %c0_12 = arith.constant 0 : index
    %c0_13 = arith.constant 0 : index
    %17 = vector.load %arg6[%c0_12, %c0_13] : memref<192x128xbf16, #tpu.memory_space<vmem>>, vector<192x128xbf16>
    %cst_14 = arith.constant dense<0.000000e+00> : vector<8x128xf32>
    %18 = tpu.matmul %16, %17, %cst_14 {dimension_numbers = #tpu.dot_dimension_numbers<[1], [0], [0], [1], [0, 0, 1, 1], [], []>} : vector<8x192xbf16>, vector<192x128xbf16>, vector<8x128xf32> -> vector<8x128xf32>
    %c0_15 = arith.constant 0 : index
    %c0_16 = arith.constant 0 : index
    %19 = vector.load %arg7[%c0_15, %c0_16] : memref<1x128xf32, #tpu.memory_space<vmem>>, vector<1x128xf32>
    %20 = vector.broadcast %19 : vector<1x128xf32> to vector<8x128xf32>
    %21 = arith.addf %18, %20 : vector<8x128xf32>
    %c0_17 = arith.constant 0 : index
    %c0_18 = arith.constant 0 : index
    %22 = vector.load %arg8[%c0_17, %c0_18] : memref<8x128xf32, #tpu.memory_space<vmem>>, vector<8x128xf32>
    tpu.vector_store %arg8[%c0_17, %c0_18], %21 {strides = array<i32>} : memref<8x128xf32, #tpu.memory_space<vmem>>, vector<8x128xf32>,
    return
  }
  func.func @transform_0(%arg0: i32) -> (i32, i32) {
    %c0_i32 = arith.constant 0 : i32
    %c0_i32_0 = arith.constant 0 : i32
    return %arg0, %c0_i32 : i32, i32
  }
  func.func @transform_1(%arg0: i32) -> (i32, i32) {
    %c0_i32 = arith.constant 0 : i32
    %c0_i32_0 = arith.constant 0 : i32
    %c0_i32_1 = arith.constant 0 : i32
    return %c0_i32, %c0_i32_0 : i32, i32
  }
  func.func @transform_2(%arg0: i32) -> (i32, i32) {
    %c0_i32 = arith.constant 0 : i32
    %c0_i32_0 = arith.constant 0 : i32
    %c0_i32_1 = arith.constant 0 : i32
    return %c0_i32, %c0_i32_0 : i32, i32
  }
  func.func @transform_3(%arg0: i32) -> (i32, i32) {
    %c0_i32 = arith.constant 0 : i32
    %c0_i32_0 = arith.constant 0 : i32
    %c0_i32_1 = arith.constant 0 : i32
    return %c0_i32, %c0_i32_0 : i32, i32
  }
  func.func @transform_4(%arg0: i32) -> (i32, i32) {
    %c0_i32 = arith.constant 0 : i32
    %c0_i32_0 = arith.constant 0 : i32
    %c0_i32_1 = arith.constant 0 : i32
    return %c0_i32, %c0_i32_0 : i32, i32
  }
  func.func @transform_5(%arg0: i32) -> (i32, i32) {
    %c0_i32 = arith.constant 0 : i32
    %c0_i32_0 = arith.constant 0 : i32
    %c0_i32_1 = arith.constant 0 : i32
    return %c0_i32, %c0_i32_0 : i32, i32
  }
  func.func @transform_6(%arg0: i32) -> (i32, i32) {
    %c0_i32 = arith.constant 0 : i32
    %c0_i32_0 = arith.constant 0 : i32
    %c0_i32_1 = arith.constant 0 : i32
    return %c0_i32, %c0_i32_0 : i32, i32
  }
  func.func @transform_7(%arg0: i32) -> (i32, i32) {
    %c0_i32 = arith.constant 0 : i32
    %c0_i32_0 = arith.constant 0 : i32
    return %arg0, %c0_i32 : i32, i32
  }
}

</mosaic_0001>

<bundles_post_ra>
// kernel: a2c_forward.1
= control target key start
LH: loop header
LB: loop body
LE: loop exit
PB: predicated region body
PF: predicated region fallthrough
CT: control target
= control target key end

     0   :  { %v632_v1 = vmov 0   ;;  %vm64_vm0 = vcmask 261120   ;;  %v34_v48 = vlaneseq  ;;  %vm465_vm1 = vcmask 523264   ;;  %s845_s1 = inlined_call_operand.vmem [shape: bf16[32,256], index: 1, kind: input, shape index: {}]   ;;  %s846_s3 = inlined_call_operand.vmem [shape: bf16[256,192], index: 3, kind: input, shape index: {}]   ;;  %s847_s0 = inlined_call_operand.vmem [shape: bf16[8,32], index: 0, kind: input, shape index: {}]   ;;  %s848_s5 = inlined_call_operand.vmem [shape: bf16[192,128], index: 5, kind: input, shape index: {}]   ;;  %s849_s2 = inlined_call_operand.vmem [shape: f32[1,256], index: 2, kind: input, shape index: {}]   ;;  %s850_s4 = inlined_call_operand.vmem [shape: f32[1,192], index: 4, kind: input, shape index: {}]   ;;  %s851_s6 = inlined_call_operand.vmem [shape: f32[1,128], index: 6, kind: input, shape index: {}]   ;;  %s852_s7 = inlined_call_operand.vmem [shape: f32[8,128], index: 7, kind: output, shape index: {}]  }
   0x1   :  { %v566_v0 = vld [vmem:[%s845_s1 + $0x14] ss:$8 sps:$4 sm:$0xff]   ;;  %100 = vmatprep.mubr.bf16.mxu0 %v632_v1  ;;  %v568_v2 = vld [vmem:[%s845_s1 + $0x10] ss:$8 sps:$4 sm:$0xff]   ;;  %v569_v3 = vld [vmem:[%s845_s1 + $0x4] ss:$8 sps:$4 sm:$0xff]  }
   0x2   :  { %80 = vmatprep.subr.bf16.mxu0 %v566_v0  ;;  %v571_v4 = vld [vmem:[%s845_s1] ss:$8 sps:$4 sm:$0xff]   ;;  %v572_v5 = vld [vmem:[%s846_s3 + $0x74] ss:$8 sps:$4 sm:$0xff]   ;;  %v574_v6 = vld [vmem:[%s846_s3 + $0x70] ss:$8 sps:$4 sm:$0xff]  }
   0x3   :  { %81 = vmatpush1.bf16.msra.mxu0 %v568_v2  ;;  %317 = vmatprep.subr.bf16.mxu1 %v572_v5  ;;  %v575_v7 = vld [vmem:[%s846_s3 + $0x64] ss:$8 sps:$4 sm:$0xff]   ;;  %v27_v8 = vld [vmem:[%s847_s0] sm:$0xf]  ;;  %v578_v10 = vld [vmem:[%s846_s3 + $0x54] ss:$8 sps:$4 sm:$0xff]  }
   0x4   :  { %82 = vmatprep.subr.bf16.mxu0 %v569_v3  ;;  %318 = vmatpush1.bf16.msra.mxu1 %v574_v6  ;;  %v577_v9 = vld [vmem:[%s846_s3 + $0x60] ss:$8 sps:$4 sm:$0xff]   ;;  %v580_v11 = vld [vmem:[%s846_s3 + $0x50] ss:$8 sps:$4 sm:$0xff]   ;;  %v581_v12 = vld [vmem:[%s846_s3 + $0x44] ss:$8 sps:$4 sm:$0xff]  }
   0x5   :  { %319 = vmatprep.subr.bf16.mxu1 %v575_v7  ;;  %v583_v13 = vld [vmem:[%s846_s3 + $0x40] ss:$8 sps:$4 sm:$0xff]   ;;  %v584_v14 = vld [vmem:[%s846_s3 + $0x34] ss:$8 sps:$4 sm:$0xff]   ;;  %v586_v15 = vld [vmem:[%s846_s3 + $0x30] ss:$8 sps:$4 sm:$0xff]  }
   0x6   :  { %v587_v16 = vld [vmem:[%s846_s3 + $0x24] ss:$8 sps:$4 sm:$0xff]   ;;  %v589_v17 = vld [vmem:[%s846_s3 + $0x20] ss:$8 sps:$4 sm:$0xff]   ;;  %v590_v18 = vld [vmem:[%s846_s3 + $0x14] ss:$8 sps:$4 sm:$0xff]  }
   0x7   :  { %83 = vmatpush1.bf16.msra.mxu0 %v571_v4  ;;  %v592_v19 = vld [vmem:[%s846_s3 + $0x10] ss:$8 sps:$4 sm:$0xff]   ;;  %v593_v20 = vld [vmem:[%s846_s3 + $0x4] ss:$8 sps:$4 sm:$0xff]   ;;  %v595_v21 = vld [vmem:[%s846_s3] ss:$8 sps:$4 sm:$0xff]  }
   0x8   :  { %469 = vmatprep.subr.bf16.mxu0 %v632_v1  ;;  %320 = vmatpush1.bf16.msra.mxu1 %v577_v9  ;;  %v596_v22 = vld [vmem:[%s846_s3 + $0xf4] ss:$8 sps:$4 sm:$0xff]   ;;  %v598_v23 = vld [vmem:[%s846_s3 + $0xf0] ss:$8 sps:$4 sm:$0xff]   ;;  %v599_v24 = vld [vmem:[%s846_s3 + $0xe4] ss:$8 sps:$4 sm:$0xff]  }
   0x9   :  { %321 = vmatprep.subr.bf16.mxu1 %v578_v10  ;;  %v601_v25 = vld [vmem:[%s846_s3 + $0xe0] ss:$8 sps:$4 sm:$0xff]   ;;  %v602_v26 = vld [vmem:[%s846_s3 + $0xd4] ss:$8 sps:$4 sm:$0xff]   ;;  %v604_v27 = vld [vmem:[%s846_s3 + $0xd0] ss:$8 sps:$4 sm:$0xff]  }
   0xa   :  { %518 = vmatmul.mubr.msk.bf16.vlgmr.msra.gmra.mxu0 %vm64_vm0, %v27_v8  ;;  %v605_v28 = vld [vmem:[%s846_s3 + $0xc4] ss:$8 sps:$4 sm:$0xff]   ;;  %v607_v29 = vld [vmem:[%s846_s3 + $0xc0] ss:$8 sps:$4 sm:$0xff]   ;;  %v608_v30 = vld [vmem:[%s846_s3 + $0xb4] ss:$8 sps:$4 sm:$0xff]  }
   0xb   :  { %v610_v31 = vld [vmem:[%s846_s3 + $0xb0] ss:$8 sps:$4 sm:$0xff]   ;;  %v611_v32 = vld [vmem:[%s846_s3 + $0xa4] ss:$8 sps:$4 sm:$0xff]   ;;  %v613_v33 = vld [vmem:[%s846_s3 + $0xa0] ss:$8 sps:$4 sm:$0xff]  }
   0xc   :  { %322 = vmatpush1.bf16.msra.mxu1 %v580_v11  ;;  %v614_v34 = vld [vmem:[%s846_s3 + $0x94] ss:$8 sps:$4 sm:$0xff]   ;;  %v616_v35 = vld [vmem:[%s846_s3 + $0x90] ss:$8 sps:$4 sm:$0xff]   ;;  %v617_v36 = vld [vmem:[%s846_s3 + $0x84] ss:$8 sps:$4 sm:$0xff]  }
   0xd   :  { %323 = vmatprep.subr.bf16.mxu1 %v581_v12  ;;  %v619_v37 = vld [vmem:[%s846_s3 + $0x80] ss:$8 sps:$4 sm:$0xff]   ;;  %v620_v38 = vld [vmem:[%s848_s5 + $0x38] sm:$0xff]   ;;  %v621_v39 = vld [vmem:[%s848_s5 + $0x30] sm:$0xff]   ;;  %v35_v49 = vshrl.u32 %v34_v48, 7 }
   0xe   :  { %470 = vmatpush1.bf16.msra.mxu0 %v620_v38  ;;  %v622_v40 = vld [vmem:[%s848_s5 + $0x28] sm:$0xff]   ;;  %v623_v41 = vld [vmem:[%s848_s5 + $0x20] sm:$0xff]   ;;  %v624_v42 = vld [vmem:[%s848_s5 + $0x18] sm:$0xff]  }
   0xf   :  { %471 = vmatprep.subr.bf16.mxu0 %v632_v1  ;;  %v625_v43 = vld [vmem:[%s848_s5 + $0x10] sm:$0xff]   ;;  %v626_v44 = vld [vmem:[%s848_s5 + $0x8] sm:$0xff]   ;;  %v627_v45 = vld [vmem:[%s848_s5] sm:$0xff]   ;;  %v36_v50 = vsub.s32 0, %v35_v49  ;;  %v40_v52 = vsub.s32 1, %v35_v49 }
  0x10   :  { %324 = vmatpush1.bf16.msra.mxu1 %v583_v13  ;;  %v628_v46 = vld [vmem:[%s848_s5 + $0x58] sm:$0xff]   ;;  %v629_v47 = vld [vmem:[%s848_s5 + $0x50] sm:$0xff]   ;;  %v32_v51 = vld [vmem:[%s849_s2] sm:$0x3] }
  0x11   :  { %325 = vmatprep.subr.bf16.mxu1 %v584_v14  ;;  %v37_v53 = vrot.slane %v32_v51, %v36_v50  ;;  %v41_v54 = vrot.slane %v32_v51, %v40_v52  ;;  %v630_v2 = vld [vmem:[%s848_s5 + $0x48] sm:$0xff]   ;;  %v631_v3 = vld [vmem:[%s848_s5 + $0x40] sm:$0xff]  }
  0x12   :  { %472 = vmatpush1.bf16.msra.mxu0 %v621_v39  ;;  %v145_v4 = vld [vmem:[%s850_s4] sm:$0x3] }
  0x13   :  { %473 = vmatprep.subr.bf16.mxu0 %v632_v1  ;;  %v150_v5 = vrot.slane %v145_v4, %v36_v50  ;;  %v154_v6 = vrot.slane %v145_v4, %v40_v52 }
  0x14   :  { %326 = vmatpush1.bf16.msra.mxu1 %v586_v15 }
  0x15   :  { %327 = vmatprep.subr.bf16.mxu1 %v587_v16  ;;  %v551_v16 = vld [vmem:[%s851_s6] ss:$0 sm:$0xff] }
  0x16   :  { %474 = vmatpush1.bf16.msra.mxu0 %v622_v40 }
  0x17   :  { %475 = vmatprep.subr.bf16.mxu0 %v632_v1 }
  0x18   :  { %328 = vmatpush1.bf16.msra.mxu1 %v589_v17 }
  0x19   :  { %329 = vmatprep.subr.bf16.mxu1 %v590_v18 }
  0x1a   :  { %476 = vmatpush1.bf16.msra.mxu0 %v623_v41 }
  0x1b   :  { %477 = vmatprep.subr.bf16.mxu0 %v632_v1 }
  0x1c   :  { %330 = vmatpush1.bf16.msra.mxu1 %v592_v19 }
  0x1d   :  { %331 = vmatprep.subr.bf16.mxu1 %v593_v20 }
  0x1e   :  { %478 = vmatpush1.bf16.msra.mxu0 %v624_v42 }
  0x1f   :  { %479 = vmatprep.subr.bf16.mxu0 %v632_v1 }
  0x20   :  { %332 = vmatpush1.bf16.msra.mxu1 %v595_v21 }
  0x21   :  { %333 = vmatprep.subr.bf16.mxu1 %v596_v22 }
  0x22   :  { %480 = vmatpush1.bf16.msra.mxu0 %v625_v43 }
  0x23   :  { %481 = vmatprep.subr.bf16.mxu0 %v632_v1 }
  0x24   :  { %334 = vmatpush2.bf16.msra.mxu1 %v598_v23 }
  0x25   :  { %335 = vmatprep.subr.bf16.mxu1 %v599_v24 }
  0x26   :  { %482 = vmatpush1.bf16.msra.mxu0 %v626_v44 }
  0x27   :  { %483 = vmatprep.subr.bf16.mxu0 %v632_v1 }
  0x28   :  { %336 = vmatpush2.bf16.msra.mxu1 %v601_v25 }
  0x29   :  { %337 = vmatprep.subr.bf16.mxu1 %v602_v26 }
  0x2a   :  { %484 = vmatpush1.bf16.msra.mxu0 %v627_v45 }
  0x2b   :  { %493 = vmatprep.subr.bf16.mxu0 %v632_v1 }
  0x2c   :  { %338 = vmatpush2.bf16.msra.mxu1 %v604_v27 }
  0x2d   :  { %339 = vmatprep.subr.bf16.mxu1 %v605_v28 }
  0x2e   :  { %494 = vmatpush2.bf16.msra.mxu0 %v628_v46 }
  0x2f   :  { %495 = vmatprep.subr.bf16.mxu0 %v632_v1 }
  0x30   :  { %340 = vmatpush2.bf16.msra.mxu1 %v607_v29 }
  0x31   :  { %341 = vmatprep.subr.bf16.mxu1 %v608_v30 }
  0x32   :  { %496 = vmatpush2.bf16.msra.mxu0 %v629_v47 }
  0x33   :  { %497 = vmatprep.subr.bf16.mxu0 %v632_v1 }
  0x34   :  { %342 = vmatpush2.bf16.msra.mxu1 %v610_v31 }
  0x35   :  { %343 = vmatprep.subr.bf16.mxu1 %v611_v32 }
  0x36   :  { %498 = vmatpush2.bf16.msra.mxu0 %v630_v2 }
  0x37   :  { %499 = vmatprep.subr.bf16.mxu0 %v632_v1 }
  0x38   :  { %344 = vmatpush2.bf16.msra.mxu1 %v613_v33 }
  0x39   :  { %345 = vmatprep.subr.bf16.mxu1 %v614_v34 }
  0x3a   :  { %500 = vmatpush2.bf16.msra.mxu0 %v631_v3 }
  0x3c   :  { %346 = vmatpush2.bf16.msra.mxu1 %v616_v35 }
  0x3d   :  { %347 = vmatprep.subr.bf16.mxu1 %v617_v36 }
  0x40   :  { %348 = vmatpush2.bf16.msra.mxu1 %v619_v37 }
  0xca   :  { %v102_v55 = vpop.f32.mrf.mxu0 }
  0xcb   :  { %v103_v56 = vadd.f32 %v102_v55, %v37_v53 }
  0xcc   :  { %v104_v57 = vpop.f32.mrf.mxu0 }
  0xcd   :  { %v105_v58 = vadd.f32 %v104_v57, %v41_v54  ;;  %v109_v59 = vmax.f32 %v103_v56, 0.0 }
  0xce   :  { %v106_v60 = vpop.f32.mrf.mxu0 }
  0xcf   :  { %v110_v61 = vmax.f32 %v105_v58, 0.0  ;;  %v111_v0 = vpack.c.bf16 %v109_v59, %v109_v59 }
  0xd0   :  { %v107_v62 = vpop.f32.mrf.mxu0 }
  0xd1   :  { %v112_v63 = vpack.c.bf16 %v110_v61, %v110_v61 }
  0xd3   :  { %349 = vmatprep.mubr.bf16.mxu1 %v112_v63 }
  0xd4   :  { %350 = vmatmul.mubr.bf16.vlgmr.msra.gmra.mxu1 %v111_v0 }
 0x194   :  { %v351_v7 = vpop.f32.mrf.mxu1 }
 0x195   :  { %v352_v8 = vadd.f32 %v351_v7, %v150_v5 }
 0x196   :  { %v353_v9 = vpop.f32.mrf.mxu1 }
 0x197   :  { %v354_v10 = vadd.f32 %v353_v9, %v154_v6  ;;  %v358_v11 = vmax.f32 %v352_v8, 0.0 }
 0x198   :  { %v355_v12 = vpop.f32.mrf.mxu1 }
 0x199   :  { %v359_v13 = vmax.f32 %v354_v10, 0.0  ;;  %v360_v15 = vpack.c.bf16 %v358_v11, %v358_v11 }
 0x19a   :  { %v356_v14 = vpop.f32.mrf.mxu1 }
 0x19b   :  { %v361_v1 = vpack.c.bf16 %v359_v13, %v359_v13 }
 0x19d   :  { %564 = vmatprep.mubr.msk.bf16.mxu0 %vm465_vm1, %v361_v1 }
 0x19e   :  { %502 = vmatmul.mubr.bf16.vlgmr.msra.gmra.mxu0 %v360_v15 }
 0x25e   :  { %v503_v17 = vpop.f32.mrf.mxu0 }
 0x25f   :  { %v504_v18 = vadd.f32 %v551_v16, %v503_v17 }
 0x260   :  { %v505_v19 = vpop.f32.mrf.mxu0 }
 0x261   :  { %509 = vst [vmem:[%s852_s7] sm:$0xff] %v504_v18 }
 0x262   :  { %v506_v20 = vpop.f32.mrf.mxu0 }
 0x264   :  { %v507_v21 = vpop.f32.mrf.mxu0 }

</bundles_post_ra>
